<compile_context>
chip_gen: v6e
topology: v6e:2x2x1
jax: 0.10.0
libtpu: 0.0.40
codegen_flags: <defaults>
</compile_context>

<pallas_src>
import math

import jax
import jax.numpy as jnp
from jax.experimental import pallas as pl
from jax.experimental.pallas import tpu as pltpu


# ---------------------------------------------------------------------------
# Kernels
# ---------------------------------------------------------------------------

def _linear_kernel_acc_out(x_ref, w_ref, b_ref, o_ref):
    """Accumulate directly into the resident f32 output block (no scratch)."""
    k = pl.program_id(2)

    @pl.when(k == 0)
    def _init():
        o_ref[...] = jnp.zeros_like(o_ref)

    o_ref[...] += jnp.dot(
        x_ref[...], w_ref[...], preferred_element_type=jnp.float32
    )

    @pl.when(k == pl.num_programs(2) - 1)
    def _finalize():
        o_ref[...] += b_ref[...]


def _linear_kernel_scratch(x_ref, w_ref, b_ref, o_ref, acc_ref):
    """f32 scratch accumulator; used when the output dtype is not f32."""
    k = pl.program_id(2)

    @pl.when(k == 0)
    def _init():
        acc_ref[...] = jnp.zeros_like(acc_ref)

    acc_ref[...] += jnp.dot(
        x_ref[...], w_ref[...], preferred_element_type=jnp.float32
    )

    @pl.when(k == pl.num_programs(2) - 1)
    def _finalize():
        o_ref[...] = (acc_ref[...] + b_ref[...]).astype(o_ref.dtype)


# ---------------------------------------------------------------------------
# Wrappers
# ---------------------------------------------------------------------------

def _round_up(x, m):
    return ((x + m - 1) // m) * m


def prepare_linear_params(weight, bias=None, *, tn=1024, tk=512,
                          compute_dtype=jnp.bfloat16):
    """Pre-transpose / pad / cast the weight ONCE (do this at init time).

    weight: (N, K) in PyTorch nn.Linear layout.  Returns a dict with the
    (Kp, Np) contraction-major weight, (1, Np) f32 bias, and tiling metadata.
    """
    N, K = weight.shape
    tn = min(tn, _round_up(N, 128))
    tk = min(tk, _round_up(K, 128))
    Np = _round_up(N, tn)
    Kp = _round_up(K, tk)

    w_t = weight.T  # (K, N): contraction dim first -> no in-kernel transpose.
    if Kp != K or Np != N:
        w_t = jnp.pad(w_t, ((0, Kp - K), (0, Np - N)))
    if compute_dtype is not None:
        w_t = w_t.astype(compute_dtype)

    if bias is None:
        b = jnp.zeros((N,), jnp.float32)
    else:
        b = bias.astype(jnp.float32)  # bias stays f32 (added post-accumulation)
    if Np != N:
        b = jnp.pad(b, (0, Np - N))
    b = b.reshape(1, Np)

    return dict(w_p=w_t, b_p=b, N=N, K=K, tn=tn, tk=tk,
                compute_dtype=compute_dtype)


def linear_forward_prepared(x, params, *, tm=512):
    """y = x @ W.T + b using pre-prepared (transposed/padded) weights."""
    w_p = params["w_p"]
    b_p = params["b_p"]
    N, K = params["N"], params["K"]
    tn, tk = params["tn"], params["tk"]
    compute_dtype = params["compute_dtype"]

    M, Kx = x.shape
    assert Kx == K, f"x has K={Kx}, weight expects K={K}"
    out_dtype = x.dtype
    Kp, Np = w_p.shape

    x_comp_dtype = jnp.dtype(compute_dtype) if compute_dtype is not None \
        else jnp.dtype(x.dtype)
    # Sublane packing: 2-byte dtypes need row tiles in multiples of 16,
    # 1-byte in multiples of 32, 4-byte in multiples of 8.
    sub = {1: 32, 2: 16, 4: 8}.get(x_comp_dtype.itemsize, 8)
    tm = min(tm, _round_up(M, sub))
    Mp = _round_up(M, tm)

    x_p = x.astype(x_comp_dtype) if x.dtype != x_comp_dtype else x
    if Mp != M or Kp != K:
        x_p = jnp.pad(x_p, ((0, Mp - M), (0, Kp - K)))

    grid = (Mp // tm, Np // tn, Kp // tk)

    # Kernel / scratch selection: accumulate straight into f32 output blocks.
    out_is_f32 = jnp.dtype(out_dtype) == jnp.float32
    kernel = _linear_kernel_acc_out if out_is_f32 else _linear_kernel_scratch
    scratch = [] if out_is_f32 else [pltpu.VMEM((tm, tn), jnp.float32)]

    # VMEM budget from actual tile footprint (double-buffered in/out), capped
    # at 64 MiB so the same config stays safe on v7x (64 MiB VMEM per TC).
    in_item = x_comp_dtype.itemsize
    out_item = jnp.dtype(out_dtype).itemsize
    need = (2 * (tm * tk + tk * tn) * in_item       # x + w tiles, double-buffered
            + 2 * tn * 4                            # bias tile
            + 2 * tm * tn * out_item)               # output tile
    if not out_is_f32:
        need += tm * tn * 4                         # f32 accumulator scratch
    vmem_limit = min(64 * 1024 * 1024, max(32 * 1024 * 1024, int(need * 1.5)))

    # Truthful byte traffic: W is re-streamed Mp/tm times, x Np/tn times.
    flops = 2 * M * N * K
    bytes_accessed = (Mp * Kp * in_item * (Np // tn)
                      + Kp * Np * in_item * (Mp // tm)
                      + Np * 4
                      + Mp * Np * out_item)

    out_p = pl.pallas_call(
        kernel,
        out_shape=jax.ShapeDtypeStruct((Mp, Np), out_dtype),
        grid_spec=pltpu.PrefetchScalarGridSpec(
            num_scalar_prefetch=0,
            grid=grid,
            in_specs=[
                pl.BlockSpec((tm, tk), lambda i, j, k: (i, k)),  # x tile
                pl.BlockSpec((tk, tn), lambda i, j, k: (k, j)),  # weight tile
                pl.BlockSpec((1, tn), lambda i, j, k: (0, j)),   # bias tile
            ],
            out_specs=pl.BlockSpec((tm, tn), lambda i, j, k: (i, j)),
            scratch_shapes=scratch,
        ),
        compiler_params=pltpu.CompilerParams(
            dimension_semantics=("parallel", "parallel", "arbitrary"),
            vmem_limit_bytes=vmem_limit,
        ),
        cost_estimate=pl.CostEstimate(
            flops=flops, transcendentals=0, bytes_accessed=bytes_accessed
        ),
    )(x_p, w_p, b_p)

    if Mp != M or Np != N:
        out_p = out_p[:M, :N]
    return out_p


def linear_forward(x, weight, bias=None, *, tm=512, tn=1024, tk=512,
                   compute_dtype=jnp.bfloat16):
    """One-off convenience wrapper.  For repeated calls, prepare once with
    prepare_linear_params() and call linear_forward_prepared()."""
    params = prepare_linear_params(weight, bias, tn=tn, tk=tk,
                                   compute_dtype=compute_dtype)
    return linear_forward_prepared(x, params, tm=tm)


def init_linear_params(key, in_features, out_features):
    """Deterministic init matching the PyTorch module's reset_parameters()."""
    kw, kb = jax.random.split(key)
    # kaiming_uniform_(a=sqrt(5)) -> bound = sqrt(6/((1+a^2)*fan_in)) = 1/sqrt(fan_in)
    bound_w = 1.0 / math.sqrt(in_features)
    weight = jax.random.uniform(
        kw, (out_features, in_features), jnp.float32, -bound_w, bound_w
    )
    bound_b = 1.0 / math.sqrt(in_features)
    bias = jax.random.uniform(
        kb, (out_features,), jnp.float32, -bound_b, bound_b
    )
    return weight, bias


if __name__ == "__main__":
    in_features = 32
    out_features = 128
    batch = 8

    key = jax.random.PRNGKey(0)
    kx, kp = jax.random.split(key)

    x = jax.random.normal(kx, (batch, in_features), jnp.float32)
    weight, bias = init_linear_params(kp, in_features, out_features)

    # max_iter bookkeeping from the module (no effect on exact matmul path)
    max_iter = in_features * out_features // 2

    y_ref = x @ weight.T + bias

    # Default path: weight prepared once, bf16 MXU compute, f32 accumulation.
    params = prepare_linear_params(weight, bias)
    y = linear_forward_prepared(x, params)
    y = jax.block_until_ready(y)
    assert y.shape == (batch, out_features)
    assert jnp.allclose(y, y_ref, atol=3e-2, rtol=3e-2), float(
        jnp.max(jnp.abs(y - y_ref))
    )

    # Exact f32 compute path (tight tolerance).
    y32 = linear_forward(x, weight, bias, compute_dtype=None)
    y32 = jax.block_until_ready(y32)
    assert jnp.allclose(y32, y_ref, atol=1e-5, rtol=1e-5)

    print("KERNEL_OK")
</pallas_src>

<mosaic_0001>
module attributes {stable_mosaic.version = 11 : i64} {
  func.func @_linear_kernel_acc_out(%arg0: i32, %arg1: i32, %arg2: i32, %arg3: memref<16x128xbf16, #tpu.memory_space<vmem>>, %arg4: memref<128x128xbf16, #tpu.memory_space<vmem>>, %arg5: memref<1x128xf32, #tpu.memory_space<vmem>>, %arg6: memref<16x128xf32, #tpu.memory_space<vmem>>) attributes {dimension_semantics = [#tpu.dimension_semantics<parallel>, #tpu.dimension_semantics<parallel>, #tpu.dimension_semantics<arbitrary>], iteration_bounds = array<i64: 1, 1, 1>, scalar_prefetch = 0 : i64, scratch_operands = 0 : i64, tpu.core_type = #tpu.core_type<tc>, window_params = [{transform_indices = @transform_0, window_bounds = array<i64: 16, 128>}, {transform_indices = @transform_1, window_bounds = array<i64: 128, 128>}, {transform_indices = @transform_2, window_bounds = array<i64: 1, 128>}, {transform_indices = @transform_3, window_bounds = array<i64: 16, 128>}]} {
    %c0_i32 = arith.constant 0 : i32
    %0 = arith.cmpi eq, %arg2, %c0_i32 : i32
    %1 = arith.extui %0 : i1 to i32
    %c0_i32_0 = arith.constant 0 : i32
    %2 = arith.cmpi ne, %1, %c0_i32_0 : i32
    scf.if %2 {
      %cst_10 = arith.constant 0.000000e+00 : f32
      %12 = vector.broadcast %cst_10 : f32 to vector<16x128xf32>
      %c0_11 = arith.constant 0 : index
      %c0_12 = arith.constant 0 : index
      %13 = vector.load %arg6[%c0_11, %c0_12] : memref<16x128xf32, #tpu.memory_space<vmem>>, vector<16x128xf32>
      tpu.vector_store %arg6[%c0_11, %c0_12], %12 {strides = array<i32>} : memref<16x128xf32, #tpu.memory_space<vmem>>, vector<16x128xf32>,
    } else {
    }
    %c0 = arith.constant 0 : index
    %c0_1 = arith.constant 0 : index
    %3 = vector.load %arg6[%c0, %c0_1] : memref<16x128xf32, #tpu.memory_space<vmem>>, vector<16x128xf32>
    %c0_2 = arith.constant 0 : index
    %c0_3 = arith.constant 0 : index
    %4 = vector.load %arg3[%c0_2, %c0_3] : memref<16x128xbf16, #tpu.memory_space<vmem>>, vector<16x128xbf16>
    %c0_4 = arith.constant 0 : index
    %c0_5 = arith.constant 0 : index
    %5 = vector.load %arg4[%c0_4, %c0_5] : memref<128x128xbf16, #tpu.memory_space<vmem>>, vector<128x128xbf16>
    %cst = arith.constant dense<0.000000e+00> : vector<16x128xf32>
    %6 = tpu.matmul %4, %5, %cst {dimension_numbers = #tpu.dot_dimension_numbers<[1], [0], [0], [1], [0, 0, 1, 1], [], []>} : vector<16x128xbf16>, vector<128x128xbf16>, vector<16x128xf32> -> vector<16x128xf32>
    %7 = arith.addf %3, %6 : vector<16x128xf32>
    %c0_6 = arith.constant 0 : index
    %c0_7 = arith.constant 0 : index
    %8 = vector.load %arg6[%c0_6, %c0_7] : memref<16x128xf32, #tpu.memory_space<vmem>>, vector<16x128xf32>
    tpu.vector_store %arg6[%c0_6, %c0_7], %7 {strides = array<i32>} : memref<16x128xf32, #tpu.memory_space<vmem>>, vector<16x128xf32>,
    %c0_i32_8 = arith.constant 0 : i32
    %9 = arith.cmpi eq, %arg2, %c0_i32_8 : i32
    %10 = arith.extui %9 : i1 to i32
    %c0_i32_9 = arith.constant 0 : i32
    %11 = arith.cmpi ne, %10, %c0_i32_9 : i32
    scf.if %11 {
      %c0_10 = arith.constant 0 : index
      %c0_11 = arith.constant 0 : index
      %12 = vector.load %arg6[%c0_10, %c0_11] : memref<16x128xf32, #tpu.memory_space<vmem>>, vector<16x128xf32>
      %c0_12 = arith.constant 0 : index
      %c0_13 = arith.constant 0 : index
      %13 = vector.load %arg5[%c0_12, %c0_13] : memref<1x128xf32, #tpu.memory_space<vmem>>, vector<1x128xf32>
      %14 = vector.broadcast %13 : vector<1x128xf32> to vector<16x128xf32>
      %15 = arith.addf %12, %14 : vector<16x128xf32>
      %c0_14 = arith.constant 0 : index
      %c0_15 = arith.constant 0 : index
      %16 = vector.load %arg6[%c0_14, %c0_15] : memref<16x128xf32, #tpu.memory_space<vmem>>, vector<16x128xf32>
      tpu.vector_store %arg6[%c0_14, %c0_15], %15 {strides = array<i32>} : memref<16x128xf32, #tpu.memory_space<vmem>>, vector<16x128xf32>,
    } else {
    }
    return
  }
  func.func @transform_0(%arg0: i32, %arg1: i32, %arg2: i32) -> (i32, i32) {
    %c0_i32 = arith.constant 0 : i32
    return %arg0, %arg2 : i32, i32
  }
  func.func @transform_1(%arg0: i32, %arg1: i32, %arg2: i32) -> (i32, i32) {
    %c0_i32 = arith.constant 0 : i32
    return %arg2, %arg1 : i32, i32
  }
  func.func @transform_2(%arg0: i32, %arg1: i32, %arg2: i32) -> (i32, i32) {
    %c0_i32 = arith.constant 0 : i32
    %c0_i32_0 = arith.constant 0 : i32
    return %c0_i32, %arg1 : i32, i32
  }
  func.func @transform_3(%arg0: i32, %arg1: i32, %arg2: i32) -> (i32, i32) {
    %c0_i32 = arith.constant 0 : i32
    return %arg0, %arg1 : i32, i32
  }
}

</mosaic_0001>

<bundles_post_ra>
// kernel: tpu_custom_call.1
= control target key start
LH: loop header
LB: loop body
LE: loop exit
PB: predicated region body
PF: predicated region fallthrough
CT: control target
= control target key end

     0   :  { %8 = vsyncpa [#allocation3], 0  ;;  %s367_s0 = inlined_call_operand.hbm [shape: bf16[16,128], index: 0, kind: input, shape index: {}]   ;;  %s368_s1 = inlined_call_operand.hbm [shape: bf16[128,128], index: 1, kind: input, shape index: {}]   ;;  %s369_s2 = inlined_call_operand.vmem [shape: f32[1,128], index: 2, kind: input, shape index: {}]   ;;  %s370_s3 = inlined_call_operand.hbm [shape: f32[16,128], index: 3, kind: output, shape index: {}]  }
   0x1   :  { %9 = vsyncpa [#allocation6], 0 }
   0x2   :  { %10 = vsyncpa [#allocation4], 0  ;;  %s326_s12 = smov [#allocation2]  }
   0x3   :  { %s16_s13 = sshll.u32 %s326_s12, 4  ;;  %s17_s13 = int_to_ptr.vmem [resolvable:$true] %s16_s13 }
   0x4   :  { %s268_s14 = scalar_lea.vmem %s17_s13, 128  ;;  %p273_p1 = scmp.lt.s32.totalorder %s17_s13, %s17_s13 }
   0x5   :  { %p269_p0 = scmp.ne.s32.totalorder %s17_s13, %s268_s14  ;;  %p274_p2 = scmp.lt.s32.totalorder %s268_s14, %s268_s14 }
   0x7   :  { %p275_p3 = por %p274_p2, %p273_p1 }
   0x9   :  { %p276_p4 = pnand %p275_p3, %p269_p0 }
   0xb   :  { %279 = shalt.err (!%p276_p4)
}
   0xc   :  { %s327_s15 = smov 64   ;;  %s328_s16 = smov 4  }
   0xd   :  { %22 = dma.hbm_to_vmem [thread:$0]  %s367_s0, 128, %s17_s13, [#allocation3], %s327_s15, %s327_s15, %s328_s16  }
   0xe   :  { %s329_s19 = smov [#allocation5]  }
   0xf   :  { %s28_s20 = sshll.u32 %s329_s19, 4  ;;  %s29_s20 = int_to_ptr.vmem [resolvable:$true] %s28_s20 }
  0x10   :  { %s288_s21 = scalar_lea.vmem %s29_s20, 1024  ;;  %p293_p6 = scmp.lt.s32.totalorder %s29_s20, %s29_s20 }
  0x11   :  { %p289_p5 = scmp.ne.s32.totalorder %s29_s20, %s288_s21  ;;  %p294_p7 = scmp.lt.s32.totalorder %s288_s21, %s288_s21 }
  0x13   :  { %p295_p8 = por %p294_p7, %p293_p6 }
  0x15   :  { %p296_p9 = pnand %p295_p8, %p289_p5 }
  0x17   :  { %299 = shalt.err (!%p296_p9)
}
  0x18   :  { %34 = dma.hbm_to_vmem [thread:$0]  %s368_s1, 1024, %s29_s20, [#allocation6], %s327_s15, %s327_s15, %s328_s16  }
  0x19   :  { %320 = dma.done.wait [#allocation3], 128  }
  0x1a   :  { %321 = vsyncadd [#allocation3], 4294967168 }
  0x1b   :  { %322 = dma.done.wait [#allocation6], 1024  }
  0x1c   :  { %323 = vsyncadd [#allocation6], 4294966272  ;;  %v330_v0 = vmov 0.0   ;;  %vm331_vm0 = vmmov 0   ;;  %v251_v1 = vld [vmem:[#allocation5 + $0x38] sm:$0xff]   ;;  %v252_v2 = vld [vmem:[#allocation5 + $0x30] sm:$0xff]  }
  0x1d   :  { %222 = vmatprep.subr.bf16.mxu0 %v330_v0  ;;  %238 = vmatprep.mubr.msk.bf16.mxu0 %vm331_vm0, %v330_v0  ;;  %v253_v3 = vld [vmem:[#allocation5 + $0x28] sm:$0xff]   ;;  %v254_v4 = vld [vmem:[#allocation5 + $0x20] sm:$0xff]   ;;  %v255_v5 = vld [vmem:[#allocation5 + $0x18] sm:$0xff]   ;;  %s332_s24 = smov [#allocation7]  }
  0x1e   :  { %223 = vmatpush3.bf16.msra.mxu0 %v251_v1  ;;  %v256_v6 = vld [vmem:[#allocation5 + $0x10] sm:$0xff]   ;;  %v257_v7 = vld [vmem:[#allocation5 + $0x8] sm:$0xff]   ;;  %v258_v8 = vld [vmem:[#allocation5] sm:$0xff]   ;;  %s190_s25 = sshll.u32 %s332_s24, 4  ;;  %s191_s25 = int_to_ptr.vmem [resolvable:$true] %s190_s25 }
  0x1f   :  { %224 = vmatprep.subr.bf16.mxu0 %v330_v0  ;;  %v259_v9 = vld [vmem:[#allocation2] sm:$0xff]   ;;  %s300_s26 = scalar_lea.vmem %s191_s25, 256  ;;  %p305_p11 = scmp.lt.s32.totalorder %s191_s25, %s191_s25 }
  0x20   :  { %v212_v11 = vld [vmem:[%s369_s2] ss:$0 sm:$0xff]  ;;  %p301_p10 = scmp.ne.s32.totalorder %s191_s25, %s300_s26  ;;  %p306_p12 = scmp.lt.s32.totalorder %s300_s26, %s300_s26 }
  0x22   :  { %225 = vmatpush3.bf16.msra.mxu0 %v252_v2  ;;  %p307_p13 = por %p306_p12, %p305_p11 }
  0x23   :  { %226 = vmatprep.subr.bf16.mxu0 %v330_v0 }
  0x24   :  { %p308_p0 = pnand %p307_p13, %p301_p10 }
  0x26   :  { %227 = vmatpush3.bf16.msra.mxu0 %v253_v3 }
  0x27   :  { %228 = vmatprep.subr.bf16.mxu0 %v330_v0 }
  0x2a   :  { %229 = vmatpush3.bf16.msra.mxu0 %v254_v4 }
  0x2b   :  { %230 = vmatprep.subr.bf16.mxu0 %v330_v0 }
  0x2e   :  { %231 = vmatpush3.bf16.msra.mxu0 %v255_v5 }
  0x2f   :  { %232 = vmatprep.subr.bf16.mxu0 %v330_v0 }
  0x32   :  { %233 = vmatpush3.bf16.msra.mxu0 %v256_v6 }
  0x33   :  { %234 = vmatprep.subr.bf16.mxu0 %v330_v0 }
  0x36   :  { %235 = vmatpush3.bf16.msra.mxu0 %v257_v7 }
  0x37   :  { %236 = vmatprep.subr.bf16.mxu0 %v330_v0 }
  0x3a   :  { %237 = vmatpush3.bf16.msra.mxu0 %v258_v8 }
  0x3d   :  { %239 = vmatmul.mubr.bf16.vlgmr.msra.gmra.mxu0 %v259_v9 }
  0xfd   :  { %v158_v10 = vpop.f32.mrf.mxu0 }
  0xfe   :  { %v181_v13 = vadd.f32 %v212_v11, %v158_v10 }
  0xff   :  { %v240_v12 = vpop.f32.mrf.mxu0 }
 0x100   :  { %183 = vst [vmem:[#allocation7] sm:$0xff] %v181_v13 }
 0x101   :  { %v161_v14 = vpop.f32.mrf.mxu0 }
 0x102   :  { %v182_v16 = vadd.f32 %v212_v11, %v161_v14 }
 0x103   :  { %v241_v15 = vpop.f32.mrf.mxu0 }
 0x104   :  { %184 = vst [vmem:[#allocation7 + $0x8] sm:$0xff] %v182_v16 }
 0x105   :  { %311 = shalt.err (!%p308_p0)
}
 0x106   :  { %s333_s27 = smov 128   ;;  %s334_s28 = smov 8  }
 0x107   :  { %196 = dma.vmem_to_hbm [thread:$0]  %s191_s25, 256, %s370_s3, [#allocation4], %s333_s27, %s333_s27, %s334_s28  }
 0x108   :  { %324 = dma.done.wait [#allocation4], 256  }
 0x109   :  { %325 = vsyncadd [#allocation4], 4294967040 }
 0x10a   :  { %200 = vsyncpa [#allocation3], 1 }
 0x10b   :  { %201 = vsyncpa [#allocation6], 1 }
 0x10c   :  { %202 = vsyncpa [#allocation4], 1 }

</bundles_post_ra>
